<compile_context>
chip_gen: v7x
topology: tpu7x:2x2x1
jax: 0.10.0
libtpu: 0.0.40
codegen_flags: <defaults>
</compile_context>

<pallas_src>
import numpy as np
import jax
import jax.numpy as jnp
from jax import lax
from jax.experimental import pallas as pl
from jax.experimental.pallas import tpu as pltpu


def bottleneck_kernel(x_ref, w1_ref, w2_ref, w3_ref, b1_ref, b2_ref, b3_ref,
                      o_ref):
    # x_ref: (1, H, W, Cin) bf16      o_ref: (1, H, W, Cin) bf16
    # w1_ref: (Cin, C) bf16           w2_ref: (3C, 3C) bf16, where
    #   w2_ref[dy*C + ci, dx*C + co] = w2_hwio[dy, dx, ci, co] * bn2_scale[co]
    # w3_ref: (C, Cin) bf16           b1:(1,C)  b2:(1,C)  b3:(1,Cin)  f32
    _, H, W, Cin = x_ref.shape
    C = w1_ref.shape[1]
    HW = H * W
    f32, bf16 = jnp.float32, jnp.bfloat16

    x_bf = x_ref[0].reshape(HW, Cin)                 # bf16, no upcast here

    # ---- 1x1 conv (BN scale folded into w1) + bias + ReLU ------------------
    t1 = jnp.dot(x_bf, w1_ref[...], preferred_element_type=f32)
    t1 = jnp.maximum(t1 + b1_ref[...], 0.0)          # (HW, C) f32
    t1 = t1.astype(bf16).reshape(H, W, C)

    # ---- 3x3 conv, padding=1, stride=1 --------------------------------------
    # LHS packs the dy taps along channels (built in bf16):
    #   lhs[y, x] = [t1[y-1, x], t1[y, x], t1[y+1, x]]   (zero rows at edges)
    zrow = jnp.zeros((1, W, C), bf16)
    up = jnp.concatenate([zrow, t1[:H - 1]], axis=0)       # t1[y-1]
    down = jnp.concatenate([t1[1:], zrow], axis=0)          # t1[y+1]
    lhs = jnp.concatenate([up, t1, down], axis=-1).reshape(HW, 3 * C)

    # Single MXU dot (K=3C, N=3C); output columns [dx*C:(dx+1)*C] are the dx
    # taps:  p_dx[y, x] = sum_dy t1[y+dy-1, x] @ w2[dy, dx]
    p = jnp.dot(lhs, w2_ref[...], preferred_element_type=f32)   # (HW, 3C) f32
    p0, p1, p2 = p[:, :C], p[:, C:2 * C], p[:, 2 * C:]

    # out3[y, x] = p0[y, x-1] + p1[y, x] + p2[y, x+1].  In the flattened
    # (HW, C) view the +-1 column shifts only wrap at the columns that must be
    # zeroed anyway, so an XLU roll + boundary-column mask is exact.
    xcol = lax.broadcasted_iota(jnp.int32, (H, W, C), 1).reshape(HW, C)
    left = jnp.where(xcol == 0, 0.0, pltpu.roll(p0, shift=1, axis=0))
    right = jnp.where(xcol == W - 1, 0.0, pltpu.roll(p2, shift=HW - 1, axis=0))
    t2 = jnp.maximum(p1 + left + right + b2_ref[...], 0.0)      # (HW, C) f32
    t2 = t2.astype(bf16)

    # ---- 1x1 conv back to Cin (BN scale folded into w3) + bias --------------
    t3 = jnp.dot(t2, w3_ref[...], preferred_element_type=f32) + b3_ref[...]

    # ---- residual add (upcast only here) + ReLU -----------------------------
    out = jnp.maximum(t3 + x_bf.astype(f32), 0.0)
    o_ref[0] = out.reshape(H, W, Cin).astype(o_ref.dtype)


def prepare_params(params):
    """Fold eval-mode BN scales into the conv weights and pack for the kernel."""
    Cin, C = params["w1"].shape
    w1 = (params["w1"] * params["s1"].reshape(1, C)).astype(jnp.bfloat16)   # (Cin, C)
    w2s = params["w2"] * params["s2"].reshape(1, 1, 1, C)                   # (3,3,C,C) HWIO
    # Pack: rows = dy*C + ci (matches the dy-packed LHS), cols = dx*C + co.
    w2_all = jnp.transpose(w2s, (0, 2, 1, 3)).reshape(3 * C, 3 * C).astype(jnp.bfloat16)
    w3 = (params["w3"] * params["s3"].reshape(1, Cin)).astype(jnp.bfloat16)  # (C, Cin)
    b1 = params["b1"].reshape(1, C).astype(jnp.float32)
    b2 = params["b2"].reshape(1, C).astype(jnp.float32)
    b3 = params["b3"].reshape(1, Cin).astype(jnp.float32)
    return (w1, w2_all, w3, b1, b2, b3)


def bottleneck_block_nhwc(x_nhwc, weights):
    """Core entry point. x_nhwc: (N, H, W, Cin) bf16. Returns (N, H, W, Cin) bf16."""
    N, H, W, Cin = x_nhwc.shape
    w1, w2_all, w3, b1, b2, b3 = weights
    C = w1.shape[1]
    assert Cin == 4 * C, "residual requires in_channels == out_channels * 4"
    assert W % 8 == 0 and H >= 2 and W >= 2, "kernel assumes sublane-friendly W"

    def full_spec(a):
        nd = a.ndim
        return pl.BlockSpec(a.shape, lambda n, _nd=nd: (0,) * _nd)

    # VMEM budget: double-buffered activation blocks + weights + in-kernel
    # temporaries, clamped to the physical VMEM of this chip generation.
    act_in = H * W * Cin * 2                       # bf16 input block
    act_out = H * W * Cin * 2                      # bf16 output block
    w_bytes = (w1.size + w2_all.size + w3.size) * 2 \
              + (b1.size + b2.size + b3.size) * 4
    # t1 (f32+bf16), lhs bf16, p f32, shifted taps f32, t2 (f32+bf16),
    # t3 f32, residual f32, iota i32 -- generous upper bound.
    tmp_bytes = H * W * (C * (4 + 2) + 3 * C * 2 + 3 * C * 4 + 3 * C * 4
                         + C * (4 + 2) + Cin * 4 + Cin * 4 + C * 4)
    needed = 2 * (act_in + act_out) + 2 * w_bytes + tmp_bytes
    try:
        phys_vmem = int(pltpu.get_tpu_info().vmem_capacity_bytes)
    except Exception:
        phys_vmem = 64 << 20                       # conservative (v7x per-core)
    vmem_limit = int(min(max(needed + (8 << 20), 32 << 20),
                         phys_vmem - (2 << 20)))

    return pl.pallas_call(
        bottleneck_kernel,
        out_shape=jax.ShapeDtypeStruct((N, H, W, Cin), jnp.bfloat16),
        grid_spec=pltpu.PrefetchScalarGridSpec(
            num_scalar_prefetch=0,
            grid=(N,),
            in_specs=[pl.BlockSpec((1, H, W, Cin), lambda n: (n, 0, 0, 0))]
                     + [full_spec(a) for a in weights],
            out_specs=pl.BlockSpec((1, H, W, Cin), lambda n: (n, 0, 0, 0))),
        compiler_params=pltpu.CompilerParams(
            dimension_semantics=("parallel",),
            vmem_limit_bytes=vmem_limit),
    )(x_nhwc, *weights)


def bottleneck_block(x_nchw, params):
    """NCHW/f32 compatibility wrapper matching the PyTorch module interface.

    Note: in a full network keep activations NHWC/bf16 and call
    bottleneck_block_nhwc directly -- the two transposes here are an extra
    full HBM read+write pass each.
    """
    weights = prepare_params(params)
    x = jnp.transpose(x_nchw, (0, 2, 3, 1)).astype(jnp.bfloat16)
    out = bottleneck_block_nhwc(x, weights)
    return jnp.transpose(out, (0, 3, 1, 2)).astype(jnp.float32)


def make_params(key, in_channels, out_channels, eps=1e-5):
    """Deterministic synthetic weights + folded eval-mode BN scale/bias."""
    C, Cin = out_channels, in_channels
    ks = jax.random.split(key, 15)
    w1 = jax.random.normal(ks[0], (Cin, C), jnp.float32) / np.sqrt(Cin)
    w2 = jax.random.normal(ks[1], (3, 3, C, C), jnp.float32) / np.sqrt(9 * C)  # HWIO
    w3 = jax.random.normal(ks[2], (C, Cin), jnp.float32) / np.sqrt(C)

    def bn(kg, kb, km, kv, ch):
        gamma = 1.0 + 0.1 * jax.random.normal(kg, (ch,), jnp.float32)
        beta = 0.1 * jax.random.normal(kb, (ch,), jnp.float32)
        mean = 0.1 * jax.random.normal(km, (ch,), jnp.float32)
        var = jnp.abs(jax.random.normal(kv, (ch,), jnp.float32)) + 0.5
        s = gamma / jnp.sqrt(var + eps)
        b = beta - mean * s
        return s.reshape(1, ch), b.reshape(1, ch)

    s1, b1 = bn(ks[3], ks[4], ks[5], ks[6], C)
    s2, b2 = bn(ks[7], ks[8], ks[9], ks[10], C)
    s3, b3 = bn(ks[11], ks[12], ks[13], ks[14], Cin)
    return dict(w1=w1, w2=w2, w3=w3, s1=s1, b1=b1, s2=s2, b2=b2, s3=s3, b3=b3)


def ref_forward(x_nchw, params):
    """Pure-JAX f32 reference (lax conv, unfolded BN) for correctness checking."""
    x = jnp.transpose(x_nchw, (0, 2, 3, 1)).astype(jnp.float32)
    Cin = x.shape[-1]
    C = params["w1"].shape[1]
    dn = ("NHWC", "HWIO", "NHWC")
    y = lax.conv_general_dilated(x, params["w1"].reshape(1, 1, Cin, C),
                                 (1, 1), "VALID", dimension_numbers=dn)
    y = jnp.maximum(y * params["s1"].reshape(1, 1, 1, C)
                    + params["b1"].reshape(1, 1, 1, C), 0.0)
    y = lax.conv_general_dilated(y, params["w2"], (1, 1), "SAME",
                                 dimension_numbers=dn)
    y = jnp.maximum(y * params["s2"].reshape(1, 1, 1, C)
                    + params["b2"].reshape(1, 1, 1, C), 0.0)
    y = lax.conv_general_dilated(y, params["w3"].reshape(1, 1, C, Cin),
                                 (1, 1), "VALID", dimension_numbers=dn)
    y = y * params["s3"].reshape(1, 1, 1, Cin) + params["b3"].reshape(1, 1, 1, Cin)
    out = jnp.maximum(y + x, 0.0)
    return jnp.transpose(out, (0, 3, 1, 2))


if __name__ == "__main__":
    key = jax.random.PRNGKey(0)
    k_x, k_p = jax.random.split(key)

    N, out_channels, H, W = 2, 8, 8, 8
    in_channels = out_channels * 4                       # 32 (residual-compatible)
    x = jax.random.normal(k_x, (N, in_channels, H, W), jnp.float32)
    params = make_params(k_p, in_channels, out_channels)

    out = jax.block_until_ready(bottleneck_block(x, params))
    ref = jax.block_until_ready(ref_forward(x, params))
    # bf16 matmul operands + bf16 output (f32 accumulation) -> loose tolerance.
    np.testing.assert_allclose(np.asarray(out), np.asarray(ref),
                               rtol=5e-2, atol=1e-1)
    print("KERNEL_OK")
</pallas_src>

<mosaic_0001>
module attributes {stable_mosaic.version = 11 : i64} {
  func.func @bottleneck_kernel(%arg0: i32, %arg1: memref<1x8x8x32xbf16, #tpu.memory_space<vmem>>, %arg2: memref<32x8xbf16, #tpu.memory_space<vmem>>, %arg3: memref<24x24xbf16, #tpu.memory_space<vmem>>, %arg4: memref<8x32xbf16, #tpu.memory_space<vmem>>, %arg5: memref<1x8xf32, #tpu.memory_space<vmem>>, %arg6: memref<1x8xf32, #tpu.memory_space<vmem>>, %arg7: memref<1x32xf32, #tpu.memory_space<vmem>>, %arg8: memref<1x8x8x32xbf16, #tpu.memory_space<vmem>>) attributes {dimension_semantics = [#tpu.dimension_semantics<parallel>], iteration_bounds = array<i64: 2>, scalar_prefetch = 0 : i64, scratch_operands = 0 : i64, tpu.core_type = #tpu.core_type<tc>, window_params = [{transform_indices = @transform_0, window_bounds = array<i64: 1, 8, 8, 32>}, {pipeline_mode = #tpu.pipeline_mode<synchronous>, transform_indices = @transform_1, window_bounds = array<i64: 32, 8>}, {pipeline_mode = #tpu.pipeline_mode<synchronous>, transform_indices = @transform_2, window_bounds = array<i64: 24, 24>}, {pipeline_mode = #tpu.pipeline_mode<synchronous>, transform_indices = @transform_3, window_bounds = array<i64: 8, 32>}, {pipeline_mode = #tpu.pipeline_mode<synchronous>, transform_indices = @transform_4, window_bounds = array<i64: 1, 8>}, {pipeline_mode = #tpu.pipeline_mode<synchronous>, transform_indices = @transform_5, window_bounds = array<i64: 1, 8>}, {pipeline_mode = #tpu.pipeline_mode<synchronous>, transform_indices = @transform_6, window_bounds = array<i64: 1, 32>}, {transform_indices = @transform_7, window_bounds = array<i64: 1, 8, 8, 32>}]} {
    %c0 = arith.constant 0 : index
    %c0_0 = arith.constant 0 : index
    %c0_1 = arith.constant 0 : index
    %c0_2 = arith.constant 0 : index
    %0 = vector.load %arg1[%c0, %c0_0, %c0_1, %c0_2] : memref<1x8x8x32xbf16, #tpu.memory_space<vmem>>, vector<1x8x8x32xbf16>
    %1 = vector.shape_cast %0 : vector<1x8x8x32xbf16> to vector<8x8x32xbf16>
    %2 = vector.shape_cast %1 : vector<8x8x32xbf16> to vector<64x32xbf16>
    %c0_3 = arith.constant 0 : index
    %c0_4 = arith.constant 0 : index
    %3 = vector.load %arg2[%c0_3, %c0_4] : memref<32x8xbf16, #tpu.memory_space<vmem>>, vector<32x8xbf16>
    %cst = arith.constant dense<0.000000e+00> : vector<64x8xf32>
    %4 = tpu.matmul %2, %3, %cst {dimension_numbers = #tpu.dot_dimension_numbers<[1], [0], [0], [1], [0, 0, 1, 1], [], []>} : vector<64x32xbf16>, vector<32x8xbf16>, vector<64x8xf32> -> vector<64x8xf32>
    %c0_5 = arith.constant 0 : index
    %c0_6 = arith.constant 0 : index
    %5 = vector.load %arg5[%c0_5, %c0_6] : memref<1x8xf32, #tpu.memory_space<vmem>>, vector<1x8xf32>
    %6 = vector.broadcast %5 : vector<1x8xf32> to vector<64x8xf32>
    %7 = arith.addf %4, %6 : vector<64x8xf32>
    %cst_7 = arith.constant 0.000000e+00 : f32
    %8 = vector.broadcast %cst_7 : f32 to vector<64x8xf32>
    %9 = arith.maximumf %7, %8 : vector<64x8xf32>
    %10 = arith.truncf %9 : vector<64x8xf32> to vector<64x8xbf16>
    %11 = vector.shape_cast %10 : vector<64x8xbf16> to vector<8x8x8xbf16>
    %cst_8 = arith.constant 0.000000e+00 : bf16
    %12 = vector.broadcast %cst_8 : bf16 to vector<1x8x8xbf16>
    %13 = vector.extract_strided_slice %11 {offsets = [0, 0, 0], sizes = [7, 8, 8], strides = [1, 1, 1]} : vector<8x8x8xbf16> to vector<7x8x8xbf16>
    %14 = tpu.concatenate %12, %13 in 0 : vector<1x8x8xbf16>, vector<7x8x8xbf16> -> vector<8x8x8xbf16>
    %15 = vector.extract_strided_slice %11 {offsets = [1, 0, 0], sizes = [7, 8, 8], strides = [1, 1, 1]} : vector<8x8x8xbf16> to vector<7x8x8xbf16>
    %16 = tpu.concatenate %15, %12 in 0 : vector<7x8x8xbf16>, vector<1x8x8xbf16> -> vector<8x8x8xbf16>
    %17 = tpu.concatenate %14, %11, %16 in 2 : vector<8x8x8xbf16>, vector<8x8x8xbf16>, vector<8x8x8xbf16> -> vector<8x8x24xbf16>
    %18 = vector.shape_cast %17 : vector<8x8x24xbf16> to vector<64x24xbf16>
    %c0_9 = arith.constant 0 : index
    %c0_10 = arith.constant 0 : index
    %19 = vector.load %arg3[%c0_9, %c0_10] : memref<24x24xbf16, #tpu.memory_space<vmem>>, vector<24x24xbf16>
    %cst_11 = arith.constant dense<0.000000e+00> : vector<64x24xf32>
    %20 = tpu.matmul %18, %19, %cst_11 {dimension_numbers = #tpu.dot_dimension_numbers<[1], [0], [0], [1], [0, 0, 1, 1], [], []>} : vector<64x24xbf16>, vector<24x24xbf16>, vector<64x24xf32> -> vector<64x24xf32>
    %21 = vector.extract_strided_slice %20 {offsets = [0, 0], sizes = [64, 8], strides = [1, 1]} : vector<64x24xf32> to vector<64x8xf32>
    %22 = vector.extract_strided_slice %20 {offsets = [0, 8], sizes = [64, 8], strides = [1, 1]} : vector<64x24xf32> to vector<64x8xf32>
    %23 = vector.extract_strided_slice %20 {offsets = [0, 16], sizes = [64, 8], strides = [1, 1]} : vector<64x24xf32> to vector<64x8xf32>
    %24 = tpu.iota {dimensions = array<i32: 1>} : vector<8x8x8xi32>
    %25 = vector.shape_cast %24 : vector<8x8x8xi32> to vector<64x8xi32>
    %c0_i32 = arith.constant 0 : i32
    %26 = vector.broadcast %c0_i32 : i32 to vector<64x8xi32>
    %27 = arith.cmpi eq, %25, %26 : vector<64x8xi32>
    %c1_i32 = arith.constant 1 : i32
    %28 = tpu.dynamic_rotate %21 by %c1_i32 dim 0 : vector<64x8xf32>, i32 -> vector<64x8xf32>
    %cst_12 = arith.constant 0.000000e+00 : f32
    %29 = vector.broadcast %cst_12 : f32 to vector<64x8xf32>
    %30 = arith.select %27, %29, %28 : vector<64x8xi1>, vector<64x8xf32>
    %c7_i32 = arith.constant 7 : i32
    %31 = vector.broadcast %c7_i32 : i32 to vector<64x8xi32>
    %32 = arith.cmpi eq, %25, %31 : vector<64x8xi32>
    %c63_i32 = arith.constant 63 : i32
    %33 = tpu.dynamic_rotate %23 by %c63_i32 dim 0 : vector<64x8xf32>, i32 -> vector<64x8xf32>
    %cst_13 = arith.constant 0.000000e+00 : f32
    %34 = vector.broadcast %cst_13 : f32 to vector<64x8xf32>
    %35 = arith.select %32, %34, %33 : vector<64x8xi1>, vector<64x8xf32>
    %36 = arith.addf %22, %30 : vector<64x8xf32>
    %37 = arith.addf %36, %35 : vector<64x8xf32>
    %c0_14 = arith.constant 0 : index
    %c0_15 = arith.constant 0 : index
    %38 = vector.load %arg6[%c0_14, %c0_15] : memref<1x8xf32, #tpu.memory_space<vmem>>, vector<1x8xf32>
    %39 = vector.broadcast %38 : vector<1x8xf32> to vector<64x8xf32>
    %40 = arith.addf %37, %39 : vector<64x8xf32>
    %cst_16 = arith.constant 0.000000e+00 : f32
    %41 = vector.broadcast %cst_16 : f32 to vector<64x8xf32>
    %42 = arith.maximumf %40, %41 : vector<64x8xf32>
    %43 = arith.truncf %42 : vector<64x8xf32> to vector<64x8xbf16>
    %c0_17 = arith.constant 0 : index
    %c0_18 = arith.constant 0 : index
    %44 = vector.load %arg4[%c0_17, %c0_18] : memref<8x32xbf16, #tpu.memory_space<vmem>>, vector<8x32xbf16>
    %cst_19 = arith.constant dense<0.000000e+00> : vector<64x32xf32>
    %45 = tpu.matmul %43, %44, %cst_19 {dimension_numbers = #tpu.dot_dimension_numbers<[1], [0], [0], [1], [0, 0, 1, 1], [], []>} : vector<64x8xbf16>, vector<8x32xbf16>, vector<64x32xf32> -> vector<64x32xf32>
    %c0_20 = arith.constant 0 : index
    %c0_21 = arith.constant 0 : index
    %46 = vector.load %arg7[%c0_20, %c0_21] : memref<1x32xf32, #tpu.memory_space<vmem>>, vector<1x32xf32>
    %47 = vector.broadcast %46 : vector<1x32xf32> to vector<64x32xf32>
    %48 = arith.addf %45, %47 : vector<64x32xf32>
    %49 = arith.extf %2 : vector<64x32xbf16> to vector<64x32xf32>
    %50 = arith.addf %48, %49 : vector<64x32xf32>
    %cst_22 = arith.constant 0.000000e+00 : f32
    %51 = vector.broadcast %cst_22 : f32 to vector<64x32xf32>
    %52 = arith.maximumf %50, %51 : vector<64x32xf32>
    %53 = vector.shape_cast %52 : vector<64x32xf32> to vector<8x8x32xf32>
    %54 = arith.truncf %53 : vector<8x8x32xf32> to vector<8x8x32xbf16>
    %c0_23 = arith.constant 0 : index
    %c0_24 = arith.constant 0 : index
    %c0_25 = arith.constant 0 : index
    %c0_26 = arith.constant 0 : index
    %55 = vector.load %arg8[%c0_23, %c0_24, %c0_25, %c0_26] : memref<1x8x8x32xbf16, #tpu.memory_space<vmem>>, vector<1x8x8x32xbf16>
    %56 = vector.shape_cast %55 : vector<1x8x8x32xbf16> to vector<8x8x32xbf16>
    %57 = vector.shape_cast %54 : vector<8x8x32xbf16> to vector<1x8x8x32xbf16>
    tpu.vector_store %arg8[%c0_23, %c0_24, %c0_25, %c0_26], %57 {strides = array<i32>} : memref<1x8x8x32xbf16, #tpu.memory_space<vmem>>, vector<1x8x8x32xbf16>,
    return
  }
  func.func @transform_0(%arg0: i32) -> (i32, i32, i32, i32) {
    %c0_i32 = arith.constant 0 : i32
    %c0_i32_0 = arith.constant 0 : i32
    %c0_i32_1 = arith.constant 0 : i32
    %c0_i32_2 = arith.constant 0 : i32
    return %arg0, %c0_i32, %c0_i32_0, %c0_i32_1 : i32, i32, i32, i32
  }
  func.func @transform_1(%arg0: i32) -> (i32, i32) {
    %c0_i32 = arith.constant 0 : i32
    %c0_i32_0 = arith.constant 0 : i32
    %c0_i32_1 = arith.constant 0 : i32
    return %c0_i32, %c0_i32_0 : i32, i32
  }
  func.func @transform_2(%arg0: i32) -> (i32, i32) {
    %c0_i32 = arith.constant 0 : i32
    %c0_i32_0 = arith.constant 0 : i32
    %c0_i32_1 = arith.constant 0 : i32
    return %c0_i32, %c0_i32_0 : i32, i32
  }
  func.func @transform_3(%arg0: i32) -> (i32, i32) {
    %c0_i32 = arith.constant 0 : i32
    %c0_i32_0 = arith.constant 0 : i32
    %c0_i32_1 = arith.constant 0 : i32
    return %c0_i32, %c0_i32_0 : i32, i32
  }
  func.func @transform_4(%arg0: i32) -> (i32, i32) {
    %c0_i32 = arith.constant 0 : i32
    %c0_i32_0 = arith.constant 0 : i32
    %c0_i32_1 = arith.constant 0 : i32
    return %c0_i32, %c0_i32_0 : i32, i32
  }
  func.func @transform_5(%arg0: i32) -> (i32, i32) {
    %c0_i32 = arith.constant 0 : i32
    %c0_i32_0 = arith.constant 0 : i32
    %c0_i32_1 = arith.constant 0 : i32
    return %c0_i32, %c0_i32_0 : i32, i32
  }
  func.func @transform_6(%arg0: i32) -> (i32, i32) {
    %c0_i32 = arith.constant 0 : i32
    %c0_i32_0 = arith.constant 0 : i32
    %c0_i32_1 = arith.constant 0 : i32
    return %c0_i32, %c0_i32_0 : i32, i32
  }
  func.func @transform_7(%arg0: i32) -> (i32, i32, i32, i32) {
    %c0_i32 = arith.constant 0 : i32
    %c0_i32_0 = arith.constant 0 : i32
    %c0_i32_1 = arith.constant 0 : i32
    %c0_i32_2 = arith.constant 0 : i32
    return %arg0, %c0_i32, %c0_i32_0, %c0_i32_1 : i32, i32, i32, i32
  }
}

</mosaic_0001>

<bundles_post_ra>
// kernel: tpu_custom_call.1
= control target key start
LH: loop header
LB: loop body
LE: loop exit
PB: predicated region body
PF: predicated region fallthrough
CT: control target
= control target key end

     0   :  { %12 = vsyncpa [#allocation3], 0  ;;  %s1819_s0 = inlined_call_operand.hbm [shape: bf16[2,8,8,32], index: 0, kind: input, shape index: {}]   ;;  %s1820_s1 = inlined_call_operand.vmem [shape: bf16[32,8], index: 1, kind: input, shape index: {}]   ;;  %s1821_s2 = inlined_call_operand.vmem [shape: bf16[24,24], index: 2, kind: input, shape index: {}]   ;;  %s1822_s3 = inlined_call_operand.vmem [shape: bf16[8,32], index: 3, kind: input, shape index: {}]   ;;  %s1823_s4 = inlined_call_operand.vmem [shape: f32[1,8], index: 4, kind: input, shape index: {}]   ;;  %s1824_s5 = inlined_call_operand.vmem [shape: f32[1,8], index: 5, kind: input, shape index: {}]   ;;  %s1825_s6 = inlined_call_operand.vmem [shape: f32[1,32], index: 6, kind: input, shape index: {}]   ;;  %s1826_s7 = inlined_call_operand.hbm [shape: bf16[2,8,8,32], index: 7, kind: output, shape index: {}]  }
   0x1   :  { %14 = vsyncpa [#allocation3 + $0x1], 0 }
   0x2   :  { %15 = vsyncpa [#allocation4], 0 }
   0x3   :  { %17 = vsyncpa [#allocation4 + $0x1], 0  ;;  %s1406_s24 = smov 0   ;;  %s1408_s25 = smov 0  }
   0x4   :  { %s1410_s26 = smov 0   ;;  %s1412_s27 = smov 0  }
   0x5 LB: > { %s1427_s28 = sadd.s32 4294967295, %s1353_s27   ;;  %s1073_s29 = sadd.s32 4294967294, %s1353_s27   ;;  %s1353_s27 = sphi %s1412_s27, %s1839_s27   ;;  %s1349_s26 = sphi %s1410_s26, %s1838_s26   ;;  %s1345_s25 = sphi %s1408_s25, %s1837_s25   ;;  %s1341_s24 = sphi %s1406_s24, %s1836_s24  }
   0x6   : > { %s1431_s30 = sadd.s32 1, %s1353_s27   ;;  %s30_s8 = sadd.s32 1, %s1349_s26 }
   0x7   : > { %s27_s9 = ssub.s32 %s1353_s27, %s1431_s30  ;;  %p37_p0 = scmp.ne.s32.totalorder %s1349_s26, %s1345_s25 }
   0x8   : > { %p28_p1 = scmp.eq.s32.totalorder %s27_s9, 0  ;;  %p38_p2 = scmp.eq.s32.totalorder %s1353_s27, 0 }
   0x9   : > { %p43_p3 = scmp.ne.s32.totalorder %s1345_s25, %s1341_s24  ;;  %p44_p4 = scmp.eq.s32.totalorder %s1427_s28, 0 }
   0xa   : > { %s1443_s10 = scalar_select %p28_p1, %s1349_s26, %s30_s8  }
   0xb   : > { %p1445_p5 = por %p38_p2, %p37_p0  ;;  %p1449_p6 = por %p44_p4, %p43_p3 }
   0xc   : > { %p193_p7 = scmp.eq.s32.totalorder %s1427_s28, 1  ;;  %p199_p8 = scmp.eq.s32.totalorder %s1073_s29, 1 }
   0xd   : > { %p1202_p10 = scmp.lt.s32.totalorder %s1353_s27, 2  ;;  %s237_s15 = sand.u32 1, %s1349_s26  }
   0xe   : > { %p1456_p11 = por %p193_p7, %p37_p0  ;;  %p1460_p12 = por %p199_p8, %p43_p3 }
   0xf   : > { %s1123_s16 = sshll.u32 %s1353_s27, 9  ;;  %s1076_s17 = sshll.u32 %s237_s15, 5 }
  0x10   : > { %s1830_s13 = scalar_select %p1456_p11, 1, 0 }
  0x11   : > { %s1831_s14 = scalar_select %p1460_p12, 1, 0 }
  0x12   : > { %s1469_s20 = scalar_lea.hbm %s1819_s0, %s1123_s16  ;;  %s241_s21 = scalar_lea.vmem [#allocation2], %s1076_s17 }
  0x13   : > { %s248_s22 = sshll.u32 %s241_s21, 4  ;;  %p1473_p13 = pnand %p1202_p10, %p1445_p5  ;;  %s1477_s22 = int_to_ptr.vmem [resolvable:$true] %s248_s22 }
  0x14   : > { %s1479_s29 = scalar_lea.sflag [#allocation3], %s237_s15  ;;  %s1257_s8 = scalar_lea.hbm %s1469_s20, 512 }
  0x15   : > { %p1258_p0 = scmp.ne.s32.totalorder %s1469_s20, %s1257_s8  ;;  %p1259_p1 = pneg %p1473_p13 }
  0x16   : > { %s1262_s16 = scalar_lea.hbm %s1819_s0, 1024  ;;  %p1263_p4 = scmp.lt.u32.totalorder %s1469_s20, %s1819_s0 }
  0x17   : > { %p1260_p2 = pnand %p1259_p1, %p1258_p0  ;;  %p1264_p5 = scmp.lt.u32.totalorder %s1262_s16, %s1257_s8 }
  0x18   : > { %p1266_p8 = scmp.lt.u32.totalorder %s1257_s8, %s1469_s20 }
  0x19   : > { %p1261_p3 = pneg %p1260_p2  ;;  %p1265_p7 = por %p1264_p5, %p1263_p4 }
  0x1b   : > { %p1267_p10 = por %p1266_p8, %p1265_p7 }
  0x1d   : > { %p1268_p9 = pnand %p1267_p10, %p1261_p3 }
  0x1f   : > { %1271 = shalt.err (!%p1268_p9)
}
  0x20   : > { %s1272_s15 = scalar_lea.vmem %s1477_s22, 512  ;;  %s1355_s19 = smov [#allocation2]  }
  0x21   : > { %p1273_p0 = scmp.ne.s32.totalorder %s1477_s22, %s1272_s15  ;;  %s1277_s21 = sshll.u32 %s1355_s19, 4  ;;  %s1278_s21 = int_to_ptr.vmem [resolvable:$false] %s1277_s21 }
  0x22   : > { %s1279_s9 = scalar_lea.vmem %s1278_s21, 1024  ;;  %p1280_p11 = scmp.lt.s32.totalorder %s1477_s22, %s1278_s21 }
  0x23   : > { %p1275_p2 = pnand %p1273_p0, %p1259_p1  ;;  %p1281_p4 = scmp.lt.s32.totalorder %s1279_s9, %s1272_s15 }
  0x25   : > { %p1276_p12 = pneg %p1275_p2  ;;  %p1282_p5 = por %p1281_p4, %p1280_p11 }
  0x27   : > { %p1283_p7 = pnand %p1282_p5, %p1276_p12 }
  0x29   : > { %1286 = shalt.err (!%p1283_p7)
}
  0x2a   : > { %s1356_s8 = smov 64   ;;  %s1357_s11 = smov 4  }
  0x2b   : > { %1197 = dma.hbm_to_vmem [thread:$0]  (!%p1473_p13), %s1469_s20, 512, %s1477_s22, %s1479_s29, %s1356_s8, %s1356_s8, %s1357_s11  }
  0x2c   : > { %p1079_p9 = scmp.ge.s32.totalorder %s1353_s27, 1  ;;  %p256_p1 = scmp.lt.s32.totalorder %s1353_s27, 3 }
  0x2e   : > { %p257_p3 = pnand %p1079_p9, %p256_p1 }
  0x2f   : > { %s1510_s16 = sand.u32 (!%p257_p3), 1, %s1345_s25  }
  0x30   : > { %260 = sbr.rel (%p257_p3) target bundleno = 1249 (0x4e1), region = 48  ;;  %s1080_s17 = sshll.u32 (!%p257_p3), %s1510_s16, 5 }
  0x31   : > { %s263_s18 = scalar_lea.sflag (!%p257_p3), [#allocation3], %s1510_s16  ;;  %s266_s15 = scalar_lea.vmem (!%p257_p3), [#allocation2], %s1080_s17 }
  0x37   : > { %1332 = dma.done.wait (%p1449_p6), %s263_s18, 512  }
  0x38   : > { %1334 = vsyncadd (%p1449_p6), %s263_s18, 4294966784  ;;  %v1245_v0 = vld [vmem:[%s1820_s1] sm:$0xff]   ;;  %v1246_v1 = vld [vmem:[%s1820_s1 + $0x8] sm:$0xff]   ;;  %vm349_vm0 = vcmask 261120   ;;  %s1358_s8 = smov 8   ;;  %vm581_vm1 = vcmask 1043456  }
  0x39   : > { %1150 = vmatprep.subr.bf16.mxu0 %v1245_v0  ;;  %1184 = vmatprep.subr.bf16.mxu1 %v1245_v0  ;;  %v1526_v2 = vld [vmem:[%s266_s15] sm:$0xff]   ;;  %v1528_v3 = vld [vmem:[%s266_s15 + $0x8] sm:$0xff]   ;;  %v1530_v4 = vld [vmem:[%s266_s15 + $0x10] sm:$0xff]   ;;  %v1360_v42 = vmov 0   ;;  %vm494_vm2 = vcmask 64512   ;;  %vm519_vm3 = vcmask 130048  }
  0x3a   : > { %1151 = vmatpush3.bf16.msra.mxu0 %v1245_v0  ;;  %1186 = vmatpush3.bf16.msra.mxu1 %v1245_v0  ;;  %v1532_v5 = vld [vmem:[%s266_s15 + $0x18] sm:$0xff]   ;;  %v1082_v6 = vld [vmem:[%s1823_s4] ss:$0 sm:$0xff]  ;;  %v1252_v26 = vld [vmem:[%s1821_s2 + $0x8] ss:$0 sps:$4 sm:$0xff]   ;;  %s1359_s15 = smov 16   ;;  %v1101_v43 = vcombine.low %v1360_v42, %v1360_v42 }
  0x3b   : > { %1152 = vmatprep.subr.bf16.mxu0 %v1246_v1  ;;  %1185 = vmatprep.subr.bf16.mxu1 %v1246_v1  ;;  %v1251_v22 = vld [vmem:[%s1821_s2] sm:$0xff]   ;;  %v583_v29 = vsel %vm581_vm1, %v1252_v26, 0  ;;  %vm568_vm4 = vcmask 195584   ;;  %s1361_s20 = smov 112   ;;  %s1362_s19 = smov 120   ;;  %vm977_vm9 = vcmask 257024  }
  0x3c   : > { %1154 = vmatprep.mubr.msk.bf16.mxu0 %vm349_vm0, %v1526_v2  ;;  %1158 = vmatprep.mubr.msk.bf16.mxu1 %vm349_vm0, %v1530_v4  ;;  %p1833_p11 = scmp.ne.s32.totalorder %s1830_s13, 0  ;;  %s1363_s23 = smov [#allocation5]  }
  0x3d   : > { %s1291_s29 = sshll.u32 %s1363_s23, 4  ;;  %s1292_s29 = int_to_ptr.vmem [resolvable:$false] %s1291_s29 }
  0x3e   : > { %1153 = vmatpush3.bf16.msra.mxu0 %v1246_v1  ;;  %1187 = vmatpush3.bf16.msra.mxu1 %v1246_v1  ;;  %s1293_s12 = scalar_lea.vmem %s1292_s29, 1024 }
  0x3f   : > { %1162 = vmatprep.subr.bf16.mxu1 %v1251_v22 }
  0x41   : > { %1155 = vmatmul.mubr.msk.bf16.vlgmr.msra.gmra.mrb[0].mxu0 %vm349_vm0, %v1528_v3  ;;  %1159 = vmatmul.mubr.msk.bf16.vlgmr.msra.gmra.mrb[0].mxu1 %vm349_vm0, %v1532_v5 }
  0x42   : > { %1163 = vmatpush3.bf16.msra.mxu1 %v1251_v22 }
  0x43   : > { %1188 = vmatprep.subr.msk.bf16.mxu1 %vm581_vm1, %v1252_v26 }
  0x46   : > { %1165 = vmatpush3.bf16.msra.mxu1 %v583_v29 }
 0x114   : > { %v1156_v7 = vpop.f32.mrb[0].mxu0  ;;  %v1160_v8 = vpop.f32.mrb[0].mxu1 }
 0x115   : > { %v405_v9 = vadd.f32 %v1156_v7, %v1082_v6  ;;  %v396_v10 = vpop.f32.mrb[1].mxu0  ;;  %v412_v11 = vpop.f32.mrb[1].mxu1  ;;  %v421_v33 = vadd.f32 %v1160_v8, %v1082_v6 }
 0x116   : > { %v397_v12 = vadd.f32 %v1082_v6, %v396_v10  ;;  %v1157_v13 = vpop.f32.mrb[2].mxu0  ;;  %v413_v14 = vadd.f32 %v1082_v6, %v412_v11  ;;  %v1161_v15 = vpop.f32.mrb[2].mxu1 }
 0x117   : > { %v429_v16 = vmax.f32 %v405_v9, 0.0  ;;  %v399_v17 = vpop.f32.mrb[3].mxu0  ;;  %v415_v18 = vpop.f32.mrb[3].mxu1  ;;  %v408_v23 = vadd.f32 %v1157_v13, %v1082_v6  ;;  %v424_v30 = vadd.f32 %v1161_v15, %v1082_v6  ;;  %v433_v36 = vmax.f32 %v421_v33, 0.0 }
 0x118   : > { %v427_v19 = vmax.f32 %v397_v12, 0.0  ;;  %v431_v20 = vmax.f32 %v413_v14, 0.0  ;;  %v400_v28 = vadd.f32 %v1082_v6, %v399_v17  ;;  %v416_v38 = vadd.f32 %v1082_v6, %v415_v18 }
 0x119   : > { %v1126_v21 = vpack.c.bf16 %v429_v16, %v429_v16  ;;  %v430_v27 = vmax.f32 %v408_v23, 0.0  ;;  %v434_v34 = vmax.f32 %v424_v30, 0.0  ;;  %v1130_v39 = vpack.c.bf16 %v433_v36, %v433_v36 }
 0x11a   : > { %v1124_v24 = vpack.c.bf16 %v427_v19, %v427_v19  ;;  %v1545_v25 = vpack.c.bf16 %v431_v20, %v431_v20  ;;  %v428_v32 = vmax.f32 %v400_v28, 0.0  ;;  %v432_v40 = vmax.f32 %v416_v38, 0.0 }
 0x11b   : > { %463 = vrot.lane.b32.xlu1 %v1126_v21, %s1358_s8  ;;  %v1127_v31 = vpack.c.bf16 %v430_v27, %v430_v27  ;;  %v1131_v37 = vpack.c.bf16 %v434_v34, %v434_v34  ;;  %v650_v20 = vlaneseq }
 0x11c   : > { %459 = vrot.lane.b32.xlu0 %v1124_v24, %s1358_s8  ;;  %v1125_v35 = vpack.c.bf16 %v428_v32, %v428_v32  ;;  %v1129_v41 = vpack.c.bf16 %v432_v40, %v432_v40 }
 0x11f   : > { %480 = vrot.lane.b32.xlu1 %v1126_v21, %s1359_s15 }
 0x120   : > { %467 = vrot.lane.b32.xlu0 %v1545_v25, %s1358_s8 }
 0x123   : > { %484 = vrot.lane.b32.xlu1 %v1545_v25, %s1359_s15 }
 0x124   : > { %482 = vrot.lane.b32.xlu0 %v1127_v31, %s1359_s15 }
 0x127   : > { %465 = vrot.lane.b32.xlu1 %v1127_v31, %s1358_s8 }
 0x128   : > { %461 = vrot.lane.b32.xlu0 %v1125_v35, %s1358_s8 }
 0x12b   : > { %473 = vrot.lane.b32.xlu1 %v1131_v37, %s1358_s8 }
 0x12c   : > { %478 = vrot.lane.b32.xlu0 %v1125_v35, %s1359_s15 }
 0x12f   : > { %488 = vrot.lane.b32.xlu1 %v1130_v39, %s1359_s15 }
 0x130   : > { %471 = vrot.lane.b32.xlu0 %v1130_v39, %s1358_s8 }
 0x133   : > { %469 = vrot.lane.b32.xlu1 %v1129_v41, %s1358_s8 }
 0x134   : > { %486 = vrot.lane.b32.xlu0 %v1129_v41, %s1359_s15 }
 0x137   : > { %492 = vrot.lane.b32.xlu1 %v1101_v43, %s1359_s15 }
 0x138   : > { %490 = vrot.lane.b32.xlu0 %v1131_v37, %s1359_s15 }
 0x18d   : > { %v464_v44 = vpop.permute.xlu1 %463 }
 0x18e   : > { %v460_v45 = vpop.permute.xlu0 %459  ;;  %v503_v58 = vsel %vm494_vm2, %v1125_v35, %v464_v44 }
 0x18f   : > { %v497_v55 = vsel %vm494_vm2, 0, %v460_v45 }
 0x191   : > { %v481_v46 = vpop.permute.xlu1 %480 }
 0x192   : > { %v468_v47 = vpop.permute.xlu0 %467 }
 0x193   : > { %v509_v7 = vsel %vm494_vm2, %v1127_v31, %v468_v47 }
 0x195   : > { %v485_v48 = vpop.permute.xlu1 %484 }
 0x196   : > { %v483_v49 = vpop.permute.xlu0 %482 }
 0x197   : > { %v525_v61 = vsel %vm519_vm3, %v503_v58, %v483_v49  ;;  %v1112_v49 = vld [vmem:[%s1824_s5] ss:$0 sm:$0xff] }
 0x199   : > { %v466_v50 = vpop.permute.xlu1 %465 }
 0x19a   : > { %v462_v51 = vpop.permute.xlu0 %461  ;;  %v506_v52 = vsel %vm494_vm2, %v1126_v21, %v466_v50  ;;  %v1590_v21 = vshrl.u32 %v650_v20, 7 }
 0x19b   : > { %v500_v53 = vsel %vm494_vm2, %v1124_v24, %v462_v51  ;;  %v527_v56 = vsel %vm519_vm3, %v506_v52, %v485_v48 }
 0x19c   : > { %v523_v59 = vsel %vm519_vm3, %v500_v53, %v481_v46  ;;  %v1103_v63 = vcombine.low %v525_v61, %v527_v56  ;;  %vm661_vm5 = vcmp.lt.s32.totalorder %v1590_v21, 1  ;;  %vm652_vm6 = vcmp.eq.s32.totalorder %v1590_v21, 0 }
 0x19d   : > { %v474_v54 = vpop.permute.xlu1 %473  ;;  %vm719_vm7 = vcmp.lt.s32.totalorder %v1590_v21, 7  ;;  %vm678_vm8 = vcmp.eq.s32.totalorder %v1590_v21, 7 }
 0x19e   : > { %v479_v57 = vpop.permute.xlu0 %478  ;;  %v518_v13 = vsel %vm494_vm2, %v1130_v39, %v474_v54 }
 0x19f   : > { %v521_v60 = vsel %vm519_vm3, %v497_v55, %v479_v57 }
 0x1a0   : > { %v1102_v62 = vcombine.low %v521_v60, %v523_v59 }
 0x1a1   : > { %v489_v0 = vpop.permute.xlu1 %488 }
 0x1a2   : > { %1166 = vmatprep.mubr.msk.bf16.mxu1 %vm568_vm4, %v1102_v62  ;;  %v472_v1 = vpop.permute.xlu0 %471 }
 0x1a3   : > { %1167 = vmatmul.mubr.msk.bf16.vlgmr.msra.gmra.mrb[4].mxu1 %vm568_vm4, %v1103_v63  ;;  %v515_v15 = vsel %vm494_vm2, %v1129_v41, %v472_v1 }
 0x1a5   : > { %v470_v6 = vpop.permute.xlu1 %469 }
 0x1a6   : > { %v512_v8 = vsel %vm494_vm2, %v1545_v25, %v470_v6  ;;  %v487_v9 = vpop.permute.xlu0 %486 }
 0x1a7   : > { %v531_v10 = vsel %vm519_vm3, %v512_v8, %v489_v0  ;;  %v529_v11 = vsel %vm519_vm3, %v509_v7, %v487_v9 }
 0x1a8   : > { %v1104_v12 = vcombine.low %v529_v11, %v531_v10 }
 0x1a9   : > { %v493_v14 = vpop.permute.xlu1 %492 }
 0x1aa   : > { %v535_v16 = vsel %vm519_vm3, %v518_v13, %v493_v14  ;;  %1170 = vmatprep.mubr.msk.bf16.mxu1 %vm568_vm4, %v1104_v12  ;;  %v491_v17 = vpop.permute.xlu0 %490 }
 0x1ab   : > { %v533_v18 = vsel %vm519_vm3, %v515_v15, %v491_v17 }
 0x1ac   : > { %v1105_v19 = vcombine.low %v533_v18, %v535_v16 }
 0x1ae   : > { %1171 = vmatmul.mubr.msk.bf16.gmra.mrb[8].mxu1 %vm568_vm4, %v1105_v19 }
 0x276   : > { %v1592_v22 = vpop.f32.mrb[4].mxu1 }
 0x277   : > { %691 = vrot.lane.b32.xlu0 %v1592_v22, %s1361_s20  ;;  %v1596_v23 = vpop.f32.mrb[5].mxu1  ;;  %v655_v25 = vrot.slane %v1592_v22, 7 }
 0x278   : > { %v1598_v24 = vpop.f32.mrb[6].mxu1  ;;  %v653_v28 = vrot.slane %v1596_v23, 7 }
 0x279   : > { %v656_v26 = vrot.slane %v1598_v24, 7  ;;  %v1603_v27 = vpop.f32.mrb[7].mxu1 }
 0x27a   : > { %v654_v29 = vrot.slane %v1603_v27, 7  ;;  %689 = vrot.lane.b32.xlu1 %v1603_v27, %s1361_s20 }
 0x27b   : > { %687 = vrot.lane.b32.xlu0 %v1596_v23, %s1361_s20  ;;  %v666_v30 = vsel %vm661_vm5, %v655_v25, %v656_v26 }
 0x27c   : > { %v667_v31 = vsel %vm661_vm5, %v654_v29, %v655_v25  ;;  %v668_v32 = vsel %vm661_vm5, %v653_v28, %v654_v29  ;;  %v673_v50 = vsel %vm652_vm6, 0.0, %v666_v30  ;;  %v845_v29 = vld [vmem:[%s1822_s3] sm:$0xf] }
 0x27d   : > { %v672_v47 = vsel %vm652_vm6, 0.0, %v667_v31  ;;  %v671_v48 = vsel %vm652_vm6, 0.0, %v668_v32  ;;  %1189 = vmatprep.subr.msk.bf16.mxu0 %vm581_vm1, %v845_v29  ;;  %v878_v32 = vsel %vm581_vm1, %v845_v29, 0 }
 0x27e   : > { %693 = vrot.lane.b32.xlu1 %v1598_v24, %s1361_s20  ;;  %1175 = vmatpush3.bf16.msra.mxu0 %v878_v32  ;;  %v947_v32 = vunpack.c.l.bf16 %v1528_v3 }
 0x281   : > { %v1619_v33 = vpop.f32.mrb[8].mxu1 }
 0x282   : > { %v1621_v34 = vpop.f32.mrb[9].mxu1  ;;  %v659_v37 = vrot.slane %v1619_v33, 7 }
 0x283   : > { %v657_v35 = vrot.slane %v1621_v34, 7  ;;  %695 = vrot.lane.b32.xlu0 %v1621_v34, %s1361_s20  ;;  %v1626_v36 = vpop.f32.mrb[10].mxu1 }
 0x284   : > { %v660_v38 = vrot.slane %v1626_v36, 7  ;;  %v1630_v39 = vpop.f32.mrb[11].mxu1 }
 0x285   : > { %v658_v40 = vrot.slane %v1630_v39, 7  ;;  %697 = vrot.lane.b32.xlu1 %v1630_v39, %s1361_s20  ;;  %v665_v41 = vsel %vm661_vm5, %v656_v26, %v657_v35 }
 0x286   : > { %v669_v42 = vsel %vm661_vm5, %v660_v38, %v653_v28  ;;  %v662_v43 = vsel %vm661_vm5, %v659_v37, %v660_v38  ;;  %v674_v52 = vsel %vm652_vm6, 0.0, %v665_v41 }
 0x287   : > { %699 = vrot.lane.b32.xlu0 %v1619_v33, %s1361_s20  ;;  %v664_v44 = vsel %vm661_vm5, %v657_v35, %v658_v40  ;;  %v663_v45 = vsel %vm661_vm5, %v658_v40, %v659_v37  ;;  %v677_v46 = vsel %vm652_vm6, 0.0, %v662_v43  ;;  %v670_v51 = vsel %vm652_vm6, 0.0, %v669_v42 }
 0x288   : > { %v675_v53 = vsel %vm652_vm6, 0.0, %v664_v44  ;;  %v676_v54 = vsel %vm652_vm6, 0.0, %v663_v45 }
 0x289   : > { %701 = vrot.lane.b32.xlu1 %v1626_v36, %s1361_s20 }
 0x28b   : > { %748 = vrot.lane.b32.xlu0 %v672_v47, %s1358_s8 }
 0x28d   : > { %746 = vrot.lane.b32.xlu1 %v671_v48, %s1358_s8 }
 0x28f   : > { %822 = vrot.lane.b32.xlu0 %v1112_v49, %s1358_s8 }
 0x291   : > { %750 = vrot.lane.b32.xlu1 %v673_v50, %s1358_s8 }
 0x293   : > { %744 = vrot.lane.b32.xlu0 %v670_v51, %s1358_s8 }
 0x295   : > { %752 = vrot.lane.b32.xlu1 %v674_v52, %s1358_s8 }
 0x297   : > { %754 = vrot.lane.b32.xlu0 %v675_v53, %s1358_s8 }
 0x299   : > { %756 = vrot.lane.b32.xlu1 %v676_v54, %s1358_s8 }
 0x2e9   : > { %v692_v55 = vpop.permute.xlu0 %691 }
 0x2ea   : > { %v713_v57 = vrot.slane %v692_v55, 1 }
 0x2ec   : > { %v690_v56 = vpop.permute.xlu1 %689 }
 0x2ed   : > { %v712_v58 = vrot.slane %v690_v56, 1  ;;  %v688_v59 = vpop.permute.xlu0 %687 }
 0x2ee   : > { %v711_v63 = vrot.slane %v688_v59, 1 }
 0x2ef   : > { %v725_v60 = vsel %vm719_vm7, %v712_v58, %v713_v57 }
 0x2f0   : > { %v694_v61 = vpop.permute.xlu1 %693  ;;  %v729_v62 = vsel %vm678_vm8, 0.0, %v725_v60  ;;  %v726_v8 = vsel %vm719_vm7, %v711_v63, %v712_v58 }
 0x2f1   : > { %v714_v0 = vrot.slane %v694_v61, 1  ;;  %786 = vrot.lane.b32.xlu1 %v729_v62, %s1358_s8  ;;  %v728_v12 = vsel %vm678_vm8, 0.0, %v726_v8 }
 0x2f3   : > { %v724_v1 = vsel %vm719_vm7, %v713_v57, %v714_v0 }
 0x2f4   : > { %v730_v6 = vsel %vm678_vm8, 0.0, %v724_v1 }
 0x2f5   : > { %788 = vrot.lane.b32.xlu0 %v730_v6, %s1358_s8  ;;  %v696_v7 = vpop.permute.xlu0 %695 }
 0x2f6   : > { %v715_v9 = vrot.slane %v696_v7, 1 }
 0x2f7   : > { %v698_v10 = vpop.permute.xlu1 %697 }
 0x2f8   : > { %v716_v11 = vrot.slane %v698_v10, 1  ;;  %v723_v13 = vsel %vm719_vm7, %v714_v0, %v715_v9 }
 0x2f9   : > { %784 = vrot.lane.b32.xlu0 %v728_v12, %s1358_s8  ;;  %v700_v14 = vpop.permute.xlu0 %699  ;;  %v731_v15 = vsel %vm678_vm8, 0.0, %v723_v13 }
 0x2fa   : > { %v717_v16 = vrot.slane %v700_v14, 1  ;;  %790 = vrot.lane.b32.xlu1 %v731_v15, %s1358_s8  ;;  %v722_v17 = vsel %vm719_vm7, %v715_v9, %v716_v11 }
 0x2fb   : > { %v702_v18 = vpop.permute.xlu1 %701  ;;  %v732_v20 = vsel %vm678_vm8, 0.0, %v722_v17 }
 0x2fc   : > { %v718_v19 = vrot.slane %v702_v18, 1  ;;  %v721_v25 = vsel %vm719_vm7, %v716_v11, %v717_v16 }
 0x2fd   : > { %758 = vrot.lane.b32.xlu0 %v677_v46, %s1358_s8  ;;  %v733_v28 = vsel %vm678_vm8, 0.0, %v721_v25  ;;  %v749_v38 = vpop.permute.xlu0 %748 }
 0x2fe   : > { %792 = vrot.lane.b32.xlu1 %v732_v20, %s1358_s8  ;;  %v720_v26 = vsel %vm719_vm7, %v717_v16, %v718_v19  ;;  %v727_v31 = vsel %vm719_vm7, %v718_v19, %v711_v63  ;;  %v770_v48 = vadd.f32 %v1592_v22, %v749_v38 }
 0x2ff   : > { %v734_v30 = vsel %vm678_vm8, 0.0, %v720_v26  ;;  %v735_v35 = vsel %vm678_vm8, 0.0, %v727_v31  ;;  %v747_v37 = vpop.permute.xlu1 %746  ;;  %v1113_v31 = vld [vmem:[%s1825_s6] ss:$0 sm:$0xff] }
 0x300   : > { %v769_v47 = vadd.f32 %v747_v37, %v1603_v27 }
 0x301   : > { %794 = vrot.lane.b32.xlu0 %v733_v28, %s1358_s8  ;;  %v823_v41 = vpop.permute.xlu0 %822 }
 0x302   : > { %796 = vrot.lane.b32.xlu1 %v734_v30, %s1358_s8 }
 0x303   : > { %v751_v40 = vpop.permute.xlu1 %750 }
 0x304   : > { %v771_v52 = vadd.f32 %v1598_v24, %v751_v40 }
 0x305   : > { %798 = vrot.lane.b32.xlu0 %v735_v35, %s1358_s8  ;;  %v745_v43 = vpop.permute.xlu0 %744  ;;  %v945_v35 = vunpack.c.l.bf16 %v1526_v2  ;;  %s1746_s8 = scalar_lea.vmem [#allocation5], %s1080_s17  ;;  %s1132_s17 = sshll.u32 %s1427_s28, 9 }
 0x306   : > { %v768_v21 = vadd.f32 %v745_v43, %v1596_v23  ;;  %s1000_s11 = sshll.u32 %s1746_s8, 4  ;;  %s1767_s20 = scalar_lea.hbm %s1826_s7, %s1132_s17  ;;  %s1769_s11 = int_to_ptr.vmem [resolvable:$true] %s1000_s11 }
 0x307   : > { %v753_v42 = vpop.permute.xlu1 %752  ;;  %s987_s28 = scalar_lea.sflag [#allocation4], %s1510_s16  ;;  %s1287_s22 = scalar_lea.vmem %s1769_s11, 512 }
 0x308   : > { %v772_v60 = vadd.f32 %v753_v42, %v1621_v34  ;;  %v946_v42 = vunpack.c.h.bf16 %v1526_v2  ;;  %p1288_p6 = scmp.ne.s32.totalorder %s1769_s11, %s1287_s22  ;;  %p1294_p8 = scmp.lt.s32.totalorder %s1769_s11, %s1292_s29 }
 0x309   : > { %v755_v45 = vpop.permute.xlu0 %754  ;;  %p1295_p10 = scmp.lt.s32.totalorder %s1293_s12, %s1287_s22 }
 0x30a   : > { %v773_v23 = vadd.f32 %v755_v45, %v1630_v39  ;;  %p1289_p12 = pnand %p1288_p6, %p1833_p11 }
 0x30b   : > { %v757_v44 = vpop.permute.xlu1 %756  ;;  %p1296_p0 = por %p1295_p10, %p1294_p8 }
 0x30c   : > { %v774_v7 = vadd.f32 %v1619_v33, %v757_v44  ;;  %p1290_p13 = pneg %p1289_p12 }
 0x30e   : > { %p1297_p2 = pnand %p1296_p0, %p1290_p13 }
 0x363   : > { %v787_v46 = vpop.permute.xlu1 %786 }
 0x364   : > { %v809_v50 = vadd.f32 %v787_v46, %v769_v47 }
 0x366   : > { %v826_v54 = vadd.f32 %v823_v41, %v809_v50 }
 0x367   : > { %v789_v49 = vpop.permute.xlu0 %788 }
 0x368   : > { %v810_v51 = vadd.f32 %v789_v49, %v770_v48  ;;  %v834_v62 = vmax.f32 %v826_v54, 0.0 }
 0x36a   : > { %v827_v57 = vadd.f32 %v823_v41, %v810_v51 }
 0x36b   : > { %v785_v53 = vpop.permute.xlu0 %784 }
 0x36c   : > { %v808_v55 = vadd.f32 %v785_v53, %v768_v21  ;;  %v791_v56 = vpop.permute.xlu1 %790  ;;  %v835_v0 = vmax.f32 %v827_v57, 0.0  ;;  %v951_v57 = vunpack.c.l.bf16 %v1532_v5 }
 0x36d   : > { %v811_v58 = vadd.f32 %v791_v56, %v771_v52 }
 0x36e   : > { %v825_v59 = vadd.f32 %v823_v41, %v808_v55 }
 0x36f   : > { %v828_v61 = vadd.f32 %v823_v41, %v811_v58  ;;  %v759_v27 = vpop.permute.xlu0 %758  ;;  %v949_v58 = vunpack.c.l.bf16 %v1530_v4 }
 0x370   : > { %v833_v22 = vmax.f32 %v825_v59, 0.0  ;;  %v793_v63 = vpop.permute.xlu1 %792  ;;  %v775_v13 = vadd.f32 %v1626_v36, %v759_v27  ;;  %v952_v27 = vunpack.c.h.bf16 %v1532_v5 }
 0x371   : > { %v836_v1 = vmax.f32 %v828_v61, 0.0  ;;  %v812_v6 = vadd.f32 %v793_v63, %v772_v60 }
 0x372   : > { %v841_v24 = vpack.c.bf16 %v834_v62, %v833_v22  ;;  %v950_v62 = vunpack.c.h.bf16 %v1530_v4 }
 0x373   : > { %v795_v8 = vpop.permute.xlu0 %794  ;;  %v842_v9 = vpack.c.bf16 %v836_v1, %v835_v0  ;;  %v829_v10 = vadd.f32 %v823_v41, %v812_v6 }
 0x374   : > { %v813_v11 = vadd.f32 %v795_v8, %v773_v23  ;;  %v797_v12 = vpop.permute.xlu1 %796  ;;  %857 = vrot.lane.b32.xlu1 %v841_v24, %s1362_s19 }
 0x375   : > { %v814_v34 = vadd.f32 %v797_v12, %v774_v7  ;;  %859 = vrot.lane.b32.xlu0 %v842_v9, %s1362_s19  ;;  %v837_v16 = vmax.f32 %v829_v10, 0.0 }
 0x376   : > { %v830_v14 = vadd.f32 %v823_v41, %v813_v11 }
 0x377   : > { %v799_v15 = vpop.permute.xlu0 %798  ;;  %v831_v18 = vadd.f32 %v823_v41, %v814_v34 }
 0x378   : > { %v838_v17 = vmax.f32 %v830_v14, 0.0  ;;  %v815_v39 = vadd.f32 %v799_v15, %v775_v13 }
 0x379   : > { %v839_v33 = vmax.f32 %v831_v18, 0.0 }
 0x37a   : > { %v832_v19 = vadd.f32 %v823_v41, %v815_v39  ;;  %v843_v20 = vpack.c.bf16 %v838_v17, %v837_v16  ;;  %v948_v41 = vunpack.c.h.bf16 %v1528_v3 }
 0x37c   : > { %v840_v25 = vmax.f32 %v832_v19, 0.0  ;;  %861 = vrot.lane.b32.xlu1 %v843_v20, %s1362_s19 }
 0x37e   : > { %v844_v26 = vpack.c.bf16 %v840_v25, %v839_v33 }
 0x380   : > { %863 = vrot.lane.b32.xlu0 %v844_v26, %s1362_s19 }
 0x3e6   : > { %v858_v28 = vpop.permute.xlu1 %857 }
 0x3e7   : > { %1176 = vmatprep.mubr.msk.bf16.mxu0 %vm494_vm2, %v858_v28  ;;  %v860_v29 = vpop.permute.xlu0 %859 }
 0x3e8   : > { %1177 = vmatmul.mubr.msk.bf16.vlgmr.msra.gmra.mrb[4].mxu0 %vm494_vm2, %v860_v29 }
 0x3ee   : > { %v862_v36 = vpop.permute.xlu1 %861 }
 0x3ef   : > { %1180 = vmatprep.mubr.msk.bf16.mxu0 %vm494_vm2, %v862_v36 }
 0x3f2   : > { %v864_v30 = vpop.permute.xlu0 %863 }
 0x3f3   : > { %1181 = vmatmul.mubr.msk.bf16.gmra.mrb[8].mxu0 %vm494_vm2, %v864_v30 }
 0x4bb   : > { %v1178_v37 = vpop.f32.mrb[4].mxu0 }
 0x4bc   : > { %v923_v38 = vadd.f32 %v1178_v37, %v1113_v31  ;;  %v914_v40 = vpop.f32.mrb[5].mxu0 }
 0x4bd   : > { %v915_v43 = vadd.f32 %v1113_v31, %v914_v40  ;;  %v1179_v44 = vpop.f32.mrb[6].mxu0 }
 0x4be   : > { %v955_v45 = vadd.f32 %v947_v32, %v923_v38  ;;  %v926_v46 = vadd.f32 %v1179_v44, %v1113_v31  ;;  %v917_v47 = vpop.f32.mrb[7].mxu0 }
 0x4bf   : > { %v953_v48 = vadd.f32 %v945_v35, %v915_v43  ;;  %v918_v49 = vadd.f32 %v1113_v31, %v917_v47 }
 0x4c0   : > { %v963_v50 = vmax.f32 %v955_v45, 0.0  ;;  %v956_v51 = vadd.f32 %v948_v41, %v926_v46 }
 0x4c1   : > { %v961_v21 = vmax.f32 %v953_v48, 0.0  ;;  %v954_v52 = vadd.f32 %v946_v42, %v918_v49 }
 0x4c2   : > { %v971_v53 = vpack.c.bf16 %v963_v50, %v963_v50  ;;  %v964_v54 = vmax.f32 %v956_v51, 0.0 }
 0x4c3   : > { %v969_v55 = vpack.c.bf16 %v961_v21, %v961_v21  ;;  %v962_v56 = vmax.f32 %v954_v52, 0.0 }
 0x4c4   : > { %980 = vst.msk [vmem:[%s1746_s8 + $0x8] sm:$0xf] %vm977_vm9, %v971_v53  ;;  %v972_v2 = vpack.c.bf16 %v964_v54, %v964_v54 }
 0x4c5   : > { %978 = vst.msk [vmem:[%s1746_s8] sm:$0xf] %vm977_vm9, %v969_v55  ;;  %v970_v3 = vpack.c.bf16 %v962_v56, %v962_v56 }
 0x4c6   : > { %981 = vst.msk [vmem:[%s1746_s8 + $0xc] sm:$0xf] %vm977_vm9, %v972_v2  ;;  %v1182_v59 = vpop.f32.mrb[8].mxu0 }
 0x4c7   : > { %979 = vst.msk [vmem:[%s1746_s8 + $0x4] sm:$0xf] %vm977_vm9, %v970_v3  ;;  %v939_v60 = vadd.f32 %v1182_v59, %v1113_v31  ;;  %v930_v61 = vpop.f32.mrb[9].mxu0 }
 0x4c8   : > { %v931_v22 = vadd.f32 %v1113_v31, %v930_v61  ;;  %v1183_v63 = vpop.f32.mrb[10].mxu0 }
 0x4c9   : > { %v959_v0 = vadd.f32 %v951_v57, %v939_v60  ;;  %v942_v1 = vadd.f32 %v1183_v63, %v1113_v31  ;;  %v933_v6 = vpop.f32.mrb[11].mxu0 }
 0x4ca   : > { %v957_v23 = vadd.f32 %v949_v58, %v931_v22  ;;  %v934_v24 = vadd.f32 %v1113_v31, %v933_v6 }
 0x4cb   : > { %v967_v7 = vmax.f32 %v959_v0, 0.0  ;;  %v960_v8 = vadd.f32 %v952_v27, %v942_v1 }
 0x4cc   : > { %v965_v9 = vmax.f32 %v957_v23, 0.0  ;;  %v958_v10 = vadd.f32 %v950_v62, %v934_v24 }
 0x4cd   : > { %v975_v4 = vpack.c.bf16 %v967_v7, %v967_v7  ;;  %v968_v5 = vmax.f32 %v960_v8, 0.0 }
 0x4ce   : > { %v973_v11 = vpack.c.bf16 %v965_v9, %v965_v9  ;;  %v966_v12 = vmax.f32 %v958_v10, 0.0 }
 0x4cf   : > { %984 = vst.msk [vmem:[%s1746_s8 + $0x18] sm:$0xf] %vm977_vm9, %v975_v4  ;;  %v976_v34 = vpack.c.bf16 %v968_v5, %v968_v5 }
 0x4d0   : > { %982 = vst.msk [vmem:[%s1746_s8 + $0x10] sm:$0xf] %vm977_vm9, %v973_v11  ;;  %v974_v13 = vpack.c.bf16 %v966_v12, %v966_v12 }
 0x4d1   : > { %985 = vst.msk [vmem:[%s1746_s8 + $0x1c] sm:$0xf] %vm977_vm9, %v976_v34 }
 0x4d2   : > { %983 = vst.msk [vmem:[%s1746_s8 + $0x14] sm:$0xf] %vm977_vm9, %v974_v13 }
 0x4d3   : > { %1300 = shalt.err (!%p1297_p2)
}
 0x4d4   : > { %s1301_s19 = scalar_lea.hbm %s1767_s20, 512  ;;  %s1305_s8 = scalar_lea.hbm %s1826_s7, 1024 }
 0x4d5   : > { %p1302_p4 = scmp.ne.s32.totalorder %s1767_s20, %s1301_s19  ;;  %p1306_p9 = scmp.lt.u32.totalorder %s1767_s20, %s1826_s7 }
 0x4d6   : > { %p1307_p1 = scmp.lt.u32.totalorder %s1305_s8, %s1301_s19  ;;  %p1309_p6 = scmp.lt.u32.totalorder %s1301_s19, %s1767_s20 }
 0x4d7   : > { %p1303_p5 = pnand %p1302_p4, %p1833_p11 }
 0x4d8   : > { %p1308_p3 = por %p1307_p1, %p1306_p9 }
 0x4d9   : > { %p1304_p7 = pneg %p1303_p5 }
 0x4da   : > { %p1310_p12 = por %p1309_p6, %p1308_p3 }
 0x4dc   : > { %p1311_p13 = pnand %p1310_p12, %p1304_p7 }
 0x4de   : > { %1314 = shalt.err (!%p1311_p13)
}
 0x4df   : > { %s1364_s15 = smov 64   ;;  %s1365_s22 = smov 4  }
 0x4e0   : > { %1192 = dma.vmem_to_hbm [thread:$0]  (%p1833_p11), %s1769_s11, 512, %s1767_s20, %s987_s28, %s1364_s15, %s1364_s15, %s1365_s22  }
 0x4e1 PF: > { %s1015_s23 = sand.u32 1, %s1341_s24   ;;  %p1834_p8 = scmp.ne.s32.totalorder %s1831_s14, 0 }
 0x4e2   : > { %p1835_p10 = scmp.ge.s32.totalorder %s1353_s27, 2  ;;  %s1016_s29 = scalar_lea.sflag [#allocation4], %s1015_s23 }
 0x4e4   : > { %p1199_p0 = pnand %p1835_p10, %p1834_p8 }
 0x4e6   : > { %1336 = dma.done.wait (!%p1199_p0), %s1016_s29, 512  }
 0x4e7   : > { %1338 = vsyncadd (!%p1199_p0), %s1016_s29, 4294966784  ;;  %p20_p2 = scmp.ge.s32.totalorder %s1431_s30, 4   ;;  %s1836_s24 = smov %s1345_s25 }
 0x4e8   : > { %s1837_s25 = smov %s1349_s26  ;;  %s1838_s26 = smov %s1443_s10 }
 0x4e9   : > { %s1839_s27 = smov %s1431_s30  ;;  %22 = sbr.rel (!%p20_p2) target bundleno = 5 (0x5), region = 93 }
 0x4f0   :  { %1021 = vsyncpa [#allocation3], 1 }
 0x4f1   :  { %1023 = vsyncpa [#allocation3 + $0x1], 1 }
 0x4f2   :  { %1024 = vsyncpa [#allocation4], 1 }
 0x4f3   :  { %1026 = vsyncpa [#allocation4 + $0x1], 1 }

</bundles_post_ra>
